<compile_context>
chip_gen: v7x
topology: tpu7x:2x2x1
jax: 0.10.0
libtpu: 0.0.40
codegen_flags: <defaults>
</compile_context>

<pallas_src>
import math

import jax
import jax.numpy as jnp
from jax.experimental import pallas as pl
from jax.experimental.pallas import tpu as pltpu

_LANES = 128
_EPS = 1e-7
_TARGET_BLOCK_ROWS = 1024      # 1024*128*4B = 512 KiB per f32 input tile
_NUM_CORE_SPLITS = 2           # leading "parallel" axis -> 2 partial sums (v7x: 2 TCs)


def _cdiv(a, b):
    return -(-a // b)


def _round_up(x, m):
    return _cdiv(x, m) * m


def _sublane_mult(dtype):
    # f32 -> 8, bf16 -> 16, int8/fp8 -> 32 (second-minor tiling constraint).
    return max(8, 32 // jnp.dtype(dtype).itemsize)


def _pack_to_blocks(x, block_rows, n_blocks, pad_value, dtype=None):
    """Flatten -> (cast) -> pad with a zero-contribution value -> (n_blocks*block_rows, 128)."""
    flat = x.reshape(-1)
    if dtype is not None and flat.dtype != jnp.dtype(dtype):
        flat = flat.astype(dtype)
    n = flat.shape[0]
    total = n_blocks * block_rows * _LANES
    if total > n:
        flat = jnp.concatenate(
            [flat, jnp.full((total - n,), pad_value, dtype=flat.dtype)])
    return flat.reshape(n_blocks * block_rows, _LANES)


def _pack_whole(x, pad_value):
    """Small operand -> one resident (rows, 128) block, rows multiple of the sublane tile."""
    flat = x.reshape(-1)
    n = flat.shape[0]
    rows = _round_up(_cdiv(max(n, 1), _LANES), _sublane_mult(flat.dtype))
    total = rows * _LANES
    if total > n:
        flat = jnp.concatenate(
            [flat, jnp.full((total - n,), pad_value, dtype=flat.dtype)])
    return flat.reshape(rows, _LANES)


def _fold8(x):
    """(R,128) f32 -> (8,128) per-lane partial sums (R is a multiple of 8)."""
    r = x.shape[0]
    if r == 8:
        return x
    return x.reshape(r // 8, 8, _LANES).sum(axis=0)


# ----------------------------------------------------------------------------
# Fused Pallas kernel: returns the 5 raw sums needed by every loss term.
# ----------------------------------------------------------------------------
def _fused_loss_sums(image_true, image_pred, disc_pred_output,
                     disc_true_feature_maps, disc_pred_feature_maps,
                     std, logp_x):
    elem_bytes = lambda a: a.size * a.dtype.itemsize

    # -- big image slabs (tiled reduction stream) -----------------------------
    n_img = math.prod(image_true.shape)
    img_sub = max(_sublane_mult(image_true.dtype), _sublane_mult(image_pred.dtype))
    img_rows = _cdiv(max(n_img, 1), _LANES)
    img_br = min(_TARGET_BLOCK_ROWS, _round_up(img_rows, img_sub))
    img_blocks = _round_up(_cdiv(img_rows, img_br), _NUM_CORE_SPLITS)
    per_core_img = img_blocks // _NUM_CORE_SPLITS
    it_slab = _pack_to_blocks(image_true, img_br, img_blocks, 0.0)
    # pad_pred = eps  =>  0*log(2eps) + 1*log(1 - eps + eps) == 0 exactly in f32
    ip_slab = _pack_to_blocks(image_pred, img_br, img_blocks, _EPS)

    # -- feature maps: ONE merged slab per side + per-block element counts ----
    fm_pairs = list(zip(disc_true_feature_maps, disc_pred_feature_maps))
    if fm_pairs:
        fm_dtype = jnp.result_type(*[a.dtype for pair in fm_pairs for a in pair])
    else:                                     # degenerate: contributes exactly 0
        fm_dtype = jnp.float32
        z = jnp.zeros((8, _LANES), jnp.float32)
        fm_pairs = [(z, z)]
    fm_sub = _sublane_mult(fm_dtype)
    fm_counts = [math.prod(t.shape) for t, _ in fm_pairs]
    fm_rows = [_cdiv(max(c, 1), _LANES) for c in fm_counts]
    fm_br = min(_TARGET_BLOCK_ROWS, _round_up(max(fm_rows), fm_sub))
    fm_nblk = [_cdiv(r, fm_br) for r in fm_rows]
    fm_blocks = _round_up(sum(fm_nblk), _NUM_CORE_SPLITS)
    per_core_fm = fm_blocks // _NUM_CORE_SPLITS

    t_parts, p_parts, counts_host = [], [], []
    for (t, p), cnt, nblk in zip(fm_pairs, fm_counts, fm_nblk):
        t_parts.append(_pack_to_blocks(t, fm_br, nblk, 0.0, dtype=fm_dtype))  # |0-0|=0
        p_parts.append(_pack_to_blocks(p, fm_br, nblk, 0.0, dtype=fm_dtype))
        counts_host += [cnt] * nblk
    pad_blk = fm_blocks - sum(fm_nblk)
    if pad_blk:
        t_parts.append(jnp.zeros((pad_blk * fm_br, _LANES), fm_dtype))
        p_parts.append(jnp.zeros((pad_blk * fm_br, _LANES), fm_dtype))
        counts_host += [1] * pad_blk          # padded blocks are all-zero anyway
    fmt_slab = jnp.concatenate(t_parts, axis=0) if len(t_parts) > 1 else t_parts[0]
    fmp_slab = jnp.concatenate(p_parts, axis=0) if len(p_parts) > 1 else p_parts[0]
    counts = jnp.asarray(counts_host, dtype=jnp.int32)

    # -- tiny resident operands (fetched once, constant index map) ------------
    disc_slabs = [_pack_whole(o, 1.0) for o in disc_pred_output]   # log(1)=0
    std_slab = _pack_whole(std, 1.0)                               # log(1)=0
    logp_slab = _pack_whole(logp_x, 0.0)
    n_disc = len(disc_slabs)

    steps = max(per_core_img, per_core_fm)
    grid = (_NUM_CORE_SPLITS, steps)

    # -- kernel ----------------------------------------------------------------
    def kernel(counts_ref, it_ref, ip_ref, *rest):
        disc_refs = rest[:n_disc]
        std_ref = rest[n_disc]
        logp_ref = rest[n_disc + 1]
        fmt_ref = rest[n_disc + 2]
        fmp_ref = rest[n_disc + 3]
        recon_acc, dlog_acc, lstd_acc, logp_acc, fm_acc = rest[n_disc + 4:]

        c = pl.program_id(0)
        g = pl.program_id(1)

        @pl.when(g == 0)
        def _init():
            recon_acc[...] = jnp.zeros_like(recon_acc)
            fm_acc[...] = jnp.zeros_like(fm_acc)
            dlog_acc[...] = jnp.zeros_like(dlog_acc)
            lstd_acc[...] = jnp.zeros_like(lstd_acc)
            logp_acc[...] = jnp.zeros_like(logp_acc)

        @pl.when((c == 0) & (g == 0))
        def _resident():
            d_acc = jnp.zeros((8, _LANES), jnp.float32)
            for dref in disc_refs:
                d_acc = d_acc + _fold8(jnp.log(dref[...].astype(jnp.float32)))
            dlog_acc[...] = d_acc
            lstd_acc[...] = _fold8(jnp.log(std_ref[...].astype(jnp.float32)))
            logp_acc[...] = _fold8(logp_ref[...].astype(jnp.float32))

        def _recon():
            it = it_ref[...].astype(jnp.float32)
            ip = ip_ref[...].astype(jnp.float32)
            # TODO(synk): on v7x, if EUP becomes binding (two f32 logs/elem once
            # HBM stops being the bottleneck), evaluate bf16 logs with f32 accum.
            r = it * jnp.log(ip + _EPS) + (1.0 - it) * jnp.log(1.0 - ip + _EPS)
            recon_acc[...] += _fold8(r)

        if per_core_img == steps:
            _recon()
        else:
            pl.when(g < per_core_img)(_recon)

        def _fm():
            d = jnp.abs(fmt_ref[...].astype(jnp.float32)
                        - fmp_ref[...].astype(jnp.float32))
            cnt = counts_ref[c * per_core_fm + g]
            inv = jnp.float32(1.0) / cnt.astype(jnp.float32)
            fm_acc[...] += inv * _fold8(d)

        if per_core_fm == steps:
            _fm()
        else:
            pl.when(g < per_core_fm)(_fm)

    # -- BlockSpecs (index maps get the scalar-prefetch ref as trailing arg) ---
    if per_core_img == steps:
        img_map = lambda c, g, counts_ref: (c * per_core_img + g, 0)
    else:
        img_map = lambda c, g, counts_ref: (
            c * per_core_img + jnp.minimum(g, per_core_img - 1), 0)
    if per_core_fm == steps:
        fm_map = lambda c, g, counts_ref: (c * per_core_fm + g, 0)
    else:
        fm_map = lambda c, g, counts_ref: (
            c * per_core_fm + jnp.minimum(g, per_core_fm - 1), 0)
    const_map = lambda c, g, counts_ref: (0, 0)

    # TODO(synk): sweep pipeline_mode=pl.Buffered(3) on the two image specs if
    # profiling shows exposed DMA at tile boundaries.
    in_specs = [pl.BlockSpec((img_br, _LANES), img_map),
                pl.BlockSpec((img_br, _LANES), img_map)]
    in_specs += [pl.BlockSpec(s.shape, const_map) for s in disc_slabs]
    in_specs += [pl.BlockSpec(std_slab.shape, const_map),
                 pl.BlockSpec(logp_slab.shape, const_map)]
    in_specs += [pl.BlockSpec((fm_br, _LANES), fm_map),
                 pl.BlockSpec((fm_br, _LANES), fm_map)]

    acc_spec = pl.BlockSpec((None, 8, _LANES), lambda c, g, counts_ref: (c, 0, 0))
    acc_shape = jax.ShapeDtypeStruct((_NUM_CORE_SPLITS, 8, _LANES), jnp.float32)

    # -- VMEM budget (double-buffered blocks) and cost estimate -----------------
    vmem_need = (2 * img_br * _LANES * (it_slab.dtype.itemsize + ip_slab.dtype.itemsize)
                 + 2 * 2 * fm_br * _LANES * jnp.dtype(fm_dtype).itemsize
                 + 2 * sum(elem_bytes(s) for s in disc_slabs)
                 + 2 * (elem_bytes(std_slab) + elem_bytes(logp_slab))
                 + 2 * 5 * 8 * _LANES * 4)
    vmem_limit = int(min(64 << 20, max(32 << 20, 2 * vmem_need)))

    bytes_acc = int(elem_bytes(it_slab) + elem_bytes(ip_slab)
                    + elem_bytes(fmt_slab) + elem_bytes(fmp_slab)
                    + sum(elem_bytes(s) for s in disc_slabs)
                    + elem_bytes(std_slab) + elem_bytes(logp_slab)
                    + counts.size * 4
                    + 5 * _NUM_CORE_SPLITS * 8 * _LANES * 4)
    transc = int(2 * it_slab.size + std_slab.size + sum(s.size for s in disc_slabs))
    flops = int(8 * it_slab.size + 4 * fmt_slab.size
                + 2 * (std_slab.size + logp_slab.size
                       + sum(s.size for s in disc_slabs)))

    outs = pl.pallas_call(
        kernel,
        out_shape=(acc_shape,) * 5,
        grid_spec=pltpu.PrefetchScalarGridSpec(
            num_scalar_prefetch=1,
            grid=grid,
            in_specs=in_specs,
            out_specs=(acc_spec,) * 5),
        compiler_params=pltpu.CompilerParams(
            dimension_semantics=("parallel", "arbitrary"),
            vmem_limit_bytes=vmem_limit),
        cost_estimate=pl.CostEstimate(
            flops=flops, transcendentals=transc, bytes_accessed=bytes_acc),
    )(counts, it_slab, ip_slab, *disc_slabs, std_slab, logp_slab,
      fmt_slab, fmp_slab)

    recon_sum, dlog_sum, lstd_sum, logp_sum, fm_loss = [jnp.sum(o) for o in outs]
    return recon_sum, dlog_sum, lstd_sum, logp_sum, fm_loss


# ----------------------------------------------------------------------------
# Module-equivalent wrapper
# ----------------------------------------------------------------------------
def final_generator_loss(image_true, image_pred, disc_pred_output,
                         disc_true_feature_maps, disc_pred_feature_maps,
                         mean, std, logp_x,
                         disc_fake_feature_map_loss_weigth=1.0,
                         gan_generator_loss_weight=1.0,
                         recon_loss_weight=1.0,
                         kl_divergence_weight=1.0,
                         cnf_loss_weight=1.0,
                         return_only_final_loss=True):
    del mean             # unused in the reference forward
    del cnf_loss_weight  # cnf loss is not part of the reference's final loss
    B = image_true.shape[0]
    D = std.shape[1]

    recon_sum, dlog_sum, lstd_sum, logp_sum, fm_loss = _fused_loss_sums(
        image_true, image_pred, disc_pred_output,
        disc_true_feature_maps, disc_pred_feature_maps, std, logp_x)

    recon_loss = recon_sum / B
    disc_fake_pred_loss = dlog_sum / B
    gan_generator_loss = -disc_fake_pred_loss
    cnf_log_prob = logp_sum / B
    const = 0.5 * math.log(2.0 * math.pi) + 0.5
    posterior_mean = -(lstd_sum / B) - D * const
    kl_divergence = posterior_mean - cnf_log_prob

    final = (disc_fake_feature_map_loss_weigth * fm_loss
             + gan_generator_loss_weight * gan_generator_loss
             - recon_loss_weight * recon_loss
             + kl_divergence_weight * kl_divergence)

    if return_only_final_loss:
        return final
    return (final, fm_loss, disc_fake_pred_loss, recon_loss,
            kl_divergence, cnf_log_prob)


# ----------------------------------------------------------------------------
# Demo / smoke test
# ----------------------------------------------------------------------------
if __name__ == "__main__":
    key = jax.random.PRNGKey(0)
    kt, kp, kd1, kd2, kf1t, kf1p, kf2t, kf2p, km, ks, kl = jax.random.split(key, 11)

    B, C, H, W = 2, 4, 16, 16        # images (NCHW)
    D = 32                           # latent dim

    image_true = jax.random.uniform(kt, (B, C, H, W), jnp.float32)
    image_pred = jax.nn.sigmoid(jax.random.normal(kp, (B, C, H, W), jnp.float32))

    disc_pred_output = [
        jax.nn.sigmoid(jax.random.normal(kd1, (B, 1, 4, 4), jnp.float32)),
        jax.nn.sigmoid(jax.random.normal(kd2, (B, 1, 2, 2), jnp.float32)),
    ]
    disc_true_feature_maps = [
        jax.random.normal(kf1t, (B, 8, 8, 8), jnp.float32),
        jax.random.normal(kf2t, (B, 16, 4, 4), jnp.float32),
    ]
    disc_pred_feature_maps = [
        jax.random.normal(kf1p, (B, 8, 8, 8), jnp.float32),
        jax.random.normal(kf2p, (B, 16, 4, 4), jnp.float32),
    ]
    mean = jax.random.normal(km, (B, D), jnp.float32)
    std = jnp.exp(0.1 * jax.random.normal(ks, (B, D), jnp.float32))   # > 0
    logp_x = jax.random.normal(kl, (B,), jnp.float32)

    loss = final_generator_loss(image_true, image_pred, disc_pred_output,
                                disc_true_feature_maps, disc_pred_feature_maps,
                                mean, std, logp_x)
    loss = jax.block_until_ready(loss)

    # pure-JAX reference check (mirrors the PyTorch module)
    def _reference():
        fm = jnp.float32(0.0)
        for t, p in zip(disc_true_feature_maps, disc_pred_feature_maps):
            fm = fm + jnp.mean(jnp.abs(t - p))
        dcat = jnp.concatenate([o.reshape(B, -1) for o in disc_pred_output], axis=1)
        dfp = jnp.log(dcat).sum(axis=1).mean()
        rec = (image_true * jnp.log(image_pred + 1e-7)
               + (1.0 - image_true) * jnp.log(1.0 - image_pred + 1e-7))
        rec = rec.reshape(B, -1).sum(axis=1).mean()
        post = (-jnp.log(std) - 0.5 * jnp.log(2.0 * jnp.pi) - 0.5).sum(axis=1)
        kld = (post - logp_x).mean()
        return fm + (-dfp) - rec + kld

    ref = _reference()
    assert loss.shape == () and bool(jnp.isfinite(loss))
    assert abs(float(loss) - float(ref)) <= 1e-3 * (1.0 + abs(float(ref))), (loss, ref)
    print("KERNEL_OK")
</pallas_src>

<mosaic_0001>
module attributes {stable_mosaic.version = 11 : i64} {
  func.func @kernel(%arg0: i32, %arg1: i32, %arg2: memref<2xi32, #tpu.memory_space<smem>>, %arg3: memref<16x128xf32, #tpu.memory_space<vmem>>, %arg4: memref<16x128xf32, #tpu.memory_space<vmem>>, %arg5: memref<8x128xf32, #tpu.memory_space<vmem>>, %arg6: memref<8x128xf32, #tpu.memory_space<vmem>>, %arg7: memref<8x128xf32, #tpu.memory_space<vmem>>, %arg8: memref<8x128xf32, #tpu.memory_space<vmem>>, %arg9: memref<8x128xf32, #tpu.memory_space<vmem>>, %arg10: memref<8x128xf32, #tpu.memory_space<vmem>>, %arg11: memref<1x8x128xf32, #tpu.memory_space<vmem>>, %arg12: memref<1x8x128xf32, #tpu.memory_space<vmem>>, %arg13: memref<1x8x128xf32, #tpu.memory_space<vmem>>, %arg14: memref<1x8x128xf32, #tpu.memory_space<vmem>>, %arg15: memref<1x8x128xf32, #tpu.memory_space<vmem>>) attributes {dimension_semantics = [#tpu.dimension_semantics<parallel>, #tpu.dimension_semantics<arbitrary>], iteration_bounds = array<i64: 2, 1>, scalar_prefetch = 1 : i64, scratch_operands = 0 : i64, tpu.core_type = #tpu.core_type<tc>, window_params = [{transform_indices = @transform_0, window_bounds = array<i64: 16, 128>}, {transform_indices = @transform_1, window_bounds = array<i64: 16, 128>}, {pipeline_mode = #tpu.pipeline_mode<synchronous>, transform_indices = @transform_2, window_bounds = array<i64: 8, 128>}, {pipeline_mode = #tpu.pipeline_mode<synchronous>, transform_indices = @transform_3, window_bounds = array<i64: 8, 128>}, {pipeline_mode = #tpu.pipeline_mode<synchronous>, transform_indices = @transform_4, window_bounds = array<i64: 8, 128>}, {pipeline_mode = #tpu.pipeline_mode<synchronous>, transform_indices = @transform_5, window_bounds = array<i64: 8, 128>}, {transform_indices = @transform_6, window_bounds = array<i64: 8, 128>}, {transform_indices = @transform_7, window_bounds = array<i64: 8, 128>}, {transform_indices = @transform_8, window_bounds = array<i64: 1, 8, 128>}, {transform_indices = @transform_9, window_bounds = array<i64: 1, 8, 128>}, {transform_indices = @transform_10, window_bounds = array<i64: 1, 8, 128>}, {transform_indices = @transform_11, window_bounds = array<i64: 1, 8, 128>}, {transform_indices = @transform_12, window_bounds = array<i64: 1, 8, 128>}]} {
    %c0_i32 = arith.constant 0 : i32
    %0 = arith.cmpi eq, %arg1, %c0_i32 : i32
    %1 = arith.extui %0 : i1 to i32
    %c0_i32_0 = arith.constant 0 : i32
    %2 = arith.cmpi ne, %1, %c0_i32_0 : i32
    scf.if %2 {
      %cst_28 = arith.constant 0.000000e+00 : f32
      %49 = vector.broadcast %cst_28 : f32 to vector<8x128xf32>
      %c0_29 = arith.constant 0 : index
      %c0_30 = arith.constant 0 : index
      %c0_31 = arith.constant 0 : index
      %50 = vector.load %arg11[%c0_29, %c0_30, %c0_31] : memref<1x8x128xf32, #tpu.memory_space<vmem>>, vector<1x8x128xf32>
      %51 = vector.shape_cast %50 : vector<1x8x128xf32> to vector<8x128xf32>
      %52 = vector.shape_cast %49 : vector<8x128xf32> to vector<1x8x128xf32>
      tpu.vector_store %arg11[%c0_29, %c0_30, %c0_31], %52 {strides = array<i32>} : memref<1x8x128xf32, #tpu.memory_space<vmem>>, vector<1x8x128xf32>,
      %cst_32 = arith.constant 0.000000e+00 : f32
      %53 = vector.broadcast %cst_32 : f32 to vector<8x128xf32>
      %c0_33 = arith.constant 0 : index
      %c0_34 = arith.constant 0 : index
      %c0_35 = arith.constant 0 : index
      %54 = vector.load %arg15[%c0_33, %c0_34, %c0_35] : memref<1x8x128xf32, #tpu.memory_space<vmem>>, vector<1x8x128xf32>
      %55 = vector.shape_cast %54 : vector<1x8x128xf32> to vector<8x128xf32>
      %56 = vector.shape_cast %53 : vector<8x128xf32> to vector<1x8x128xf32>
      tpu.vector_store %arg15[%c0_33, %c0_34, %c0_35], %56 {strides = array<i32>} : memref<1x8x128xf32, #tpu.memory_space<vmem>>, vector<1x8x128xf32>,
      %cst_36 = arith.constant 0.000000e+00 : f32
      %57 = vector.broadcast %cst_36 : f32 to vector<8x128xf32>
      %c0_37 = arith.constant 0 : index
      %c0_38 = arith.constant 0 : index
      %c0_39 = arith.constant 0 : index
      %58 = vector.load %arg12[%c0_37, %c0_38, %c0_39] : memref<1x8x128xf32, #tpu.memory_space<vmem>>, vector<1x8x128xf32>
      %59 = vector.shape_cast %58 : vector<1x8x128xf32> to vector<8x128xf32>
      %60 = vector.shape_cast %57 : vector<8x128xf32> to vector<1x8x128xf32>
      tpu.vector_store %arg12[%c0_37, %c0_38, %c0_39], %60 {strides = array<i32>} : memref<1x8x128xf32, #tpu.memory_space<vmem>>, vector<1x8x128xf32>,
      %cst_40 = arith.constant 0.000000e+00 : f32
      %61 = vector.broadcast %cst_40 : f32 to vector<8x128xf32>
      %c0_41 = arith.constant 0 : index
      %c0_42 = arith.constant 0 : index
      %c0_43 = arith.constant 0 : index
      %62 = vector.load %arg13[%c0_41, %c0_42, %c0_43] : memref<1x8x128xf32, #tpu.memory_space<vmem>>, vector<1x8x128xf32>
      %63 = vector.shape_cast %62 : vector<1x8x128xf32> to vector<8x128xf32>
      %64 = vector.shape_cast %61 : vector<8x128xf32> to vector<1x8x128xf32>
      tpu.vector_store %arg13[%c0_41, %c0_42, %c0_43], %64 {strides = array<i32>} : memref<1x8x128xf32, #tpu.memory_space<vmem>>, vector<1x8x128xf32>,
      %cst_44 = arith.constant 0.000000e+00 : f32
      %65 = vector.broadcast %cst_44 : f32 to vector<8x128xf32>
      %c0_45 = arith.constant 0 : index
      %c0_46 = arith.constant 0 : index
      %c0_47 = arith.constant 0 : index
      %66 = vector.load %arg14[%c0_45, %c0_46, %c0_47] : memref<1x8x128xf32, #tpu.memory_space<vmem>>, vector<1x8x128xf32>
      %67 = vector.shape_cast %66 : vector<1x8x128xf32> to vector<8x128xf32>
      %68 = vector.shape_cast %65 : vector<8x128xf32> to vector<1x8x128xf32>
      tpu.vector_store %arg14[%c0_45, %c0_46, %c0_47], %68 {strides = array<i32>} : memref<1x8x128xf32, #tpu.memory_space<vmem>>, vector<1x8x128xf32>,
    } else {
    }
    %c0_i32_1 = arith.constant 0 : i32
    %3 = arith.cmpi eq, %arg0, %c0_i32_1 : i32
    %c0_i32_2 = arith.constant 0 : i32
    %4 = arith.cmpi eq, %arg1, %c0_i32_2 : i32
    %5 = arith.andi %3, %4 : i1
    %6 = arith.extui %5 : i1 to i32
    %c0_i32_3 = arith.constant 0 : i32
    %7 = arith.cmpi ne, %6, %c0_i32_3 : i32
    scf.if %7 {
      %cst_28 = arith.constant 0.000000e+00 : f32
      %49 = vector.broadcast %cst_28 : f32 to vector<8x128xf32>
      %c0_29 = arith.constant 0 : index
      %c0_30 = arith.constant 0 : index
      %50 = vector.load %arg5[%c0_29, %c0_30] : memref<8x128xf32, #tpu.memory_space<vmem>>, vector<8x128xf32>
      %51 = math.log %50 : vector<8x128xf32>
      %52 = arith.addf %49, %51 : vector<8x128xf32>
      %c0_31 = arith.constant 0 : index
      %c0_32 = arith.constant 0 : index
      %53 = vector.load %arg6[%c0_31, %c0_32] : memref<8x128xf32, #tpu.memory_space<vmem>>, vector<8x128xf32>
      %54 = math.log %53 : vector<8x128xf32>
      %55 = arith.addf %52, %54 : vector<8x128xf32>
      %c0_33 = arith.constant 0 : index
      %c0_34 = arith.constant 0 : index
      %c0_35 = arith.constant 0 : index
      %56 = vector.load %arg12[%c0_33, %c0_34, %c0_35] : memref<1x8x128xf32, #tpu.memory_space<vmem>>, vector<1x8x128xf32>
      %57 = vector.shape_cast %56 : vector<1x8x128xf32> to vector<8x128xf32>
      %58 = vector.shape_cast %55 : vector<8x128xf32> to vector<1x8x128xf32>
      tpu.vector_store %arg12[%c0_33, %c0_34, %c0_35], %58 {strides = array<i32>} : memref<1x8x128xf32, #tpu.memory_space<vmem>>, vector<1x8x128xf32>,
      %c0_36 = arith.constant 0 : index
      %c0_37 = arith.constant 0 : index
      %59 = vector.load %arg7[%c0_36, %c0_37] : memref<8x128xf32, #tpu.memory_space<vmem>>, vector<8x128xf32>
      %60 = math.log %59 : vector<8x128xf32>
      %c0_38 = arith.constant 0 : index
      %c0_39 = arith.constant 0 : index
      %c0_40 = arith.constant 0 : index
      %61 = vector.load %arg13[%c0_38, %c0_39, %c0_40] : memref<1x8x128xf32, #tpu.memory_space<vmem>>, vector<1x8x128xf32>
      %62 = vector.shape_cast %61 : vector<1x8x128xf32> to vector<8x128xf32>
      %63 = vector.shape_cast %60 : vector<8x128xf32> to vector<1x8x128xf32>
      tpu.vector_store %arg13[%c0_38, %c0_39, %c0_40], %63 {strides = array<i32>} : memref<1x8x128xf32, #tpu.memory_space<vmem>>, vector<1x8x128xf32>,
      %c0_41 = arith.constant 0 : index
      %c0_42 = arith.constant 0 : index
      %64 = vector.load %arg8[%c0_41, %c0_42] : memref<8x128xf32, #tpu.memory_space<vmem>>, vector<8x128xf32>
      %c0_43 = arith.constant 0 : index
      %c0_44 = arith.constant 0 : index
      %c0_45 = arith.constant 0 : index
      %65 = vector.load %arg14[%c0_43, %c0_44, %c0_45] : memref<1x8x128xf32, #tpu.memory_space<vmem>>, vector<1x8x128xf32>
      %66 = vector.shape_cast %65 : vector<1x8x128xf32> to vector<8x128xf32>
      %67 = vector.shape_cast %64 : vector<8x128xf32> to vector<1x8x128xf32>
      tpu.vector_store %arg14[%c0_43, %c0_44, %c0_45], %67 {strides = array<i32>} : memref<1x8x128xf32, #tpu.memory_space<vmem>>, vector<1x8x128xf32>,
    } else {
    }
    %c0 = arith.constant 0 : index
    %c0_4 = arith.constant 0 : index
    %8 = vector.load %arg3[%c0, %c0_4] : memref<16x128xf32, #tpu.memory_space<vmem>>, vector<16x128xf32>
    %c0_5 = arith.constant 0 : index
    %c0_6 = arith.constant 0 : index
    %9 = vector.load %arg4[%c0_5, %c0_6] : memref<16x128xf32, #tpu.memory_space<vmem>>, vector<16x128xf32>
    %cst = arith.constant 1.000000e-07 : f32
    %10 = vector.broadcast %cst : f32 to vector<16x128xf32>
    %11 = arith.addf %9, %10 : vector<16x128xf32>
    %12 = math.log %11 : vector<16x128xf32>
    %13 = arith.mulf %8, %12 : vector<16x128xf32>
    %cst_7 = arith.constant 1.000000e+00 : f32
    %14 = vector.broadcast %cst_7 : f32 to vector<16x128xf32>
    %15 = arith.subf %14, %8 : vector<16x128xf32>
    %cst_8 = arith.constant 1.000000e+00 : f32
    %16 = vector.broadcast %cst_8 : f32 to vector<16x128xf32>
    %17 = arith.subf %16, %9 : vector<16x128xf32>
    %cst_9 = arith.constant 1.000000e-07 : f32
    %18 = vector.broadcast %cst_9 : f32 to vector<16x128xf32>
    %19 = arith.addf %17, %18 : vector<16x128xf32>
    %20 = math.log %19 : vector<16x128xf32>
    %21 = arith.mulf %15, %20 : vector<16x128xf32>
    %22 = arith.addf %13, %21 : vector<16x128xf32>
    %c0_10 = arith.constant 0 : index
    %c0_11 = arith.constant 0 : index
    %c0_12 = arith.constant 0 : index
    %23 = vector.load %arg11[%c0_10, %c0_11, %c0_12] : memref<1x8x128xf32, #tpu.memory_space<vmem>>, vector<1x8x128xf32>
    %24 = vector.shape_cast %23 : vector<1x8x128xf32> to vector<8x128xf32>
    %25 = vector.shape_cast %22 : vector<16x128xf32> to vector<2x8x128xf32>
    %cst_13 = arith.constant dense<0.000000e+00> : vector<8x128xf32>
    %26 = vector.multi_reduction <add>, %25, %cst_13 [0] : vector<2x8x128xf32> to vector<8x128xf32>
    %27 = arith.addf %24, %26 : vector<8x128xf32>
    %c0_14 = arith.constant 0 : index
    %c0_15 = arith.constant 0 : index
    %c0_16 = arith.constant 0 : index
    %28 = vector.load %arg11[%c0_14, %c0_15, %c0_16] : memref<1x8x128xf32, #tpu.memory_space<vmem>>, vector<1x8x128xf32>
    %29 = vector.shape_cast %28 : vector<1x8x128xf32> to vector<8x128xf32>
    %30 = vector.shape_cast %27 : vector<8x128xf32> to vector<1x8x128xf32>
    tpu.vector_store %arg11[%c0_14, %c0_15, %c0_16], %30 {strides = array<i32>} : memref<1x8x128xf32, #tpu.memory_space<vmem>>, vector<1x8x128xf32>,
    %c0_17 = arith.constant 0 : index
    %c0_18 = arith.constant 0 : index
    %31 = vector.load %arg9[%c0_17, %c0_18] : memref<8x128xf32, #tpu.memory_space<vmem>>, vector<8x128xf32>
    %c0_19 = arith.constant 0 : index
    %c0_20 = arith.constant 0 : index
    %32 = vector.load %arg10[%c0_19, %c0_20] : memref<8x128xf32, #tpu.memory_space<vmem>>, vector<8x128xf32>
    %33 = arith.subf %31, %32 : vector<8x128xf32>
    %34 = math.absf %33 : vector<8x128xf32>
    %c1_i32 = arith.constant 1 : i32
    %35 = arith.muli %arg0, %c1_i32 : i32
    %36 = arith.addi %35, %arg1 : i32
    %37 = arith.index_cast %36 : i32 to index
    %38 = memref.load %arg2[%37] : memref<2xi32, #tpu.memory_space<smem>>
    %39 = arith.sitofp %38 : i32 to f32
    %cst_21 = arith.constant 1.000000e+00 : f32
    %40 = arith.divf %cst_21, %39 : f32
    %c0_22 = arith.constant 0 : index
    %c0_23 = arith.constant 0 : index
    %c0_24 = arith.constant 0 : index
    %41 = vector.load %arg15[%c0_22, %c0_23, %c0_24] : memref<1x8x128xf32, #tpu.memory_space<vmem>>, vector<1x8x128xf32>
    %42 = vector.shape_cast %41 : vector<1x8x128xf32> to vector<8x128xf32>
    %43 = vector.broadcast %40 : f32 to vector<8x128xf32>
    %44 = arith.mulf %43, %34 : vector<8x128xf32>
    %45 = arith.addf %42, %44 : vector<8x128xf32>
    %c0_25 = arith.constant 0 : index
    %c0_26 = arith.constant 0 : index
    %c0_27 = arith.constant 0 : index
    %46 = vector.load %arg15[%c0_25, %c0_26, %c0_27] : memref<1x8x128xf32, #tpu.memory_space<vmem>>, vector<1x8x128xf32>
    %47 = vector.shape_cast %46 : vector<1x8x128xf32> to vector<8x128xf32>
    %48 = vector.shape_cast %45 : vector<8x128xf32> to vector<1x8x128xf32>
    tpu.vector_store %arg15[%c0_25, %c0_26, %c0_27], %48 {strides = array<i32>} : memref<1x8x128xf32, #tpu.memory_space<vmem>>, vector<1x8x128xf32>,
    return
  }
  func.func @transform_0(%arg0: i32, %arg1: i32, %arg2: memref<2xi32, #tpu.memory_space<smem>>) -> (i32, i32) {
    %c1_i32 = arith.constant 1 : i32
    %0 = arith.muli %arg0, %c1_i32 : i32
    %1 = arith.addi %0, %arg1 : i32
    %c0_i32 = arith.constant 0 : i32
    %c0_i32_0 = arith.constant 0 : i32
    return %1, %c0_i32 : i32, i32
  }
  func.func @transform_1(%arg0: i32, %arg1: i32, %arg2: memref<2xi32, #tpu.memory_space<smem>>) -> (i32, i32) {
    %c1_i32 = arith.constant 1 : i32
    %0 = arith.muli %arg0, %c1_i32 : i32
    %1 = arith.addi %0, %arg1 : i32
    %c0_i32 = arith.constant 0 : i32
    %c0_i32_0 = arith.constant 0 : i32
    return %1, %c0_i32 : i32, i32
  }
  func.func @transform_2(%arg0: i32, %arg1: i32, %arg2: memref<2xi32, #tpu.memory_space<smem>>) -> (i32, i32) {
    %c0_i32 = arith.constant 0 : i32
    %c0_i32_0 = arith.constant 0 : i32
    %c0_i32_1 = arith.constant 0 : i32
    return %c0_i32, %c0_i32_0 : i32, i32
  }
  func.func @transform_3(%arg0: i32, %arg1: i32, %arg2: memref<2xi32, #tpu.memory_space<smem>>) -> (i32, i32) {
    %c0_i32 = arith.constant 0 : i32
    %c0_i32_0 = arith.constant 0 : i32
    %c0_i32_1 = arith.constant 0 : i32
    return %c0_i32, %c0_i32_0 : i32, i32
  }
  func.func @transform_4(%arg0: i32, %arg1: i32, %arg2: memref<2xi32, #tpu.memory_space<smem>>) -> (i32, i32) {
    %c0_i32 = arith.constant 0 : i32
    %c0_i32_0 = arith.constant 0 : i32
    %c0_i32_1 = arith.constant 0 : i32
    return %c0_i32, %c0_i32_0 : i32, i32
  }
  func.func @transform_5(%arg0: i32, %arg1: i32, %arg2: memref<2xi32, #tpu.memory_space<smem>>) -> (i32, i32) {
    %c0_i32 = arith.constant 0 : i32
    %c0_i32_0 = arith.constant 0 : i32
    %c0_i32_1 = arith.constant 0 : i32
    return %c0_i32, %c0_i32_0 : i32, i32
  }
  func.func @transform_6(%arg0: i32, %arg1: i32, %arg2: memref<2xi32, #tpu.memory_space<smem>>) -> (i32, i32) {
    %c1_i32 = arith.constant 1 : i32
    %0 = arith.muli %arg0, %c1_i32 : i32
    %1 = arith.addi %0, %arg1 : i32
    %c0_i32 = arith.constant 0 : i32
    %c0_i32_0 = arith.constant 0 : i32
    return %1, %c0_i32 : i32, i32
  }
  func.func @transform_7(%arg0: i32, %arg1: i32, %arg2: memref<2xi32, #tpu.memory_space<smem>>) -> (i32, i32) {
    %c1_i32 = arith.constant 1 : i32
    %0 = arith.muli %arg0, %c1_i32 : i32
    %1 = arith.addi %0, %arg1 : i32
    %c0_i32 = arith.constant 0 : i32
    %c0_i32_0 = arith.constant 0 : i32
    return %1, %c0_i32 : i32, i32
  }
  func.func @transform_8(%arg0: i32, %arg1: i32, %arg2: memref<2xi32, #tpu.memory_space<smem>>) -> (i32, i32, i32) {
    %c0_i32 = arith.constant 0 : i32
    %c0_i32_0 = arith.constant 0 : i32
    %c0_i32_1 = arith.constant 0 : i32
    return %arg0, %c0_i32, %c0_i32_0 : i32, i32, i32
  }
  func.func @transform_9(%arg0: i32, %arg1: i32, %arg2: memref<2xi32, #tpu.memory_space<smem>>) -> (i32, i32, i32) {
    %c0_i32 = arith.constant 0 : i32
    %c0_i32_0 = arith.constant 0 : i32
    %c0_i32_1 = arith.constant 0 : i32
    return %arg0, %c0_i32, %c0_i32_0 : i32, i32, i32
  }
  func.func @transform_10(%arg0: i32, %arg1: i32, %arg2: memref<2xi32, #tpu.memory_space<smem>>) -> (i32, i32, i32) {
    %c0_i32 = arith.constant 0 : i32
    %c0_i32_0 = arith.constant 0 : i32
    %c0_i32_1 = arith.constant 0 : i32
    return %arg0, %c0_i32, %c0_i32_0 : i32, i32, i32
  }
  func.func @transform_11(%arg0: i32, %arg1: i32, %arg2: memref<2xi32, #tpu.memory_space<smem>>) -> (i32, i32, i32) {
    %c0_i32 = arith.constant 0 : i32
    %c0_i32_0 = arith.constant 0 : i32
    %c0_i32_1 = arith.constant 0 : i32
    return %arg0, %c0_i32, %c0_i32_0 : i32, i32, i32
  }
  func.func @transform_12(%arg0: i32, %arg1: i32, %arg2: memref<2xi32, #tpu.memory_space<smem>>) -> (i32, i32, i32) {
    %c0_i32 = arith.constant 0 : i32
    %c0_i32_0 = arith.constant 0 : i32
    %c0_i32_1 = arith.constant 0 : i32
    return %arg0, %c0_i32, %c0_i32_0 : i32, i32, i32
  }
}

</mosaic_0001>

<bundles_post_ra>
// kernel: tpu_custom_call.1
= control target key start
LH: loop header
LB: loop body
LE: loop exit
PB: predicated region body
PF: predicated region fallthrough
CT: control target
= control target key end

     0   :  { %s2326_s0 = inlined_call_operand.hbm [shape: s32[2], index: 0, kind: input, shape index: {}]   ;;  %s2327_s1 = inlined_call_operand.hbm [shape: f32[32,128], index: 1, kind: input, shape index: {}]   ;;  %s2328_s2 = inlined_call_operand.hbm [shape: f32[32,128], index: 2, kind: input, shape index: {}]   ;;  %s2329_s3 = inlined_call_operand.vmem [shape: f32[8,128], index: 3, kind: input, shape index: {}]   ;;  %s2330_s4 = inlined_call_operand.hbm [shape: f32[8,128], index: 4, kind: input, shape index: {}]   ;;  %s2331_s5 = inlined_call_operand.hbm [shape: f32[8,128], index: 5, kind: input, shape index: {}]   ;;  %s2332_s6 = inlined_call_operand.hbm [shape: f32[8,128], index: 6, kind: input, shape index: {}]   ;;  %s2333_s7 = inlined_call_operand.vmem [shape: f32[16,128], index: 7, kind: input, shape index: {}]   ;;  %s2334_s8 = inlined_call_operand.hbm [shape: f32[16,128], index: 8, kind: input, shape index: {}]   ;;  %s2335_s9 = inlined_call_operand.hbm [shape: f32[2,8,128], index: 9, kind: output, shape index: {0}]   ;;  %s2336_s10 = inlined_call_operand.hbm [shape: f32[2,8,128], index: 10, kind: output, shape index: {1}]   ;;  %s2337_s11 = inlined_call_operand.hbm [shape: f32[2,8,128], index: 11, kind: output, shape index: {2}]   ;;  %s2338_s12 = inlined_call_operand.hbm [shape: f32[2,8,128], index: 12, kind: output, shape index: {3}]   ;;  %s2339_s13 = inlined_call_operand.hbm [shape: f32[2,8,128], index: 13, kind: output, shape index: {4}]  }
   0x1   :  { %2358 = sst [smem:[#allocation35_spill]] %s2327_s1  ;;  %s1274_s27 = scalar_lea.hbm %s2326_s0, 16 }
   0x2   :  { %2359 = sst [smem:[#allocation36_spill]] %s2328_s2  ;;  %p1275_p0 = scmp.ne.s32.totalorder %s2326_s0, %s1274_s27 }
   0x3   :  { %2360 = sst [smem:[#allocation37_spill]] %s2329_s3  ;;  %p1278_p1 = scmp.lt.u32.totalorder %s1274_s27, %s2326_s0 }
   0x4   :  { %2361 = sst [smem:[#allocation38_spill]] %s2330_s4 }
   0x5   :  { %2362 = sst [smem:[#allocation39_spill]] %s2331_s5  ;;  %p1280_p2 = pnand %p1278_p1, %p1275_p0 }
   0x6   :  { %2363 = sst [smem:[#allocation40_spill]] %s2332_s6 }
   0x7   :  { %2364 = sst [smem:[#allocation41_spill]] %s2333_s7 }
   0x8   :  { %2365 = sst [smem:[#allocation42_spill]] %s2334_s8 }
   0x9   :  { %2366 = sst [smem:[#allocation43_spill]] %s2335_s9 }
   0xa   :  { %2367 = sst [smem:[#allocation44_spill]] %s2336_s10 }
   0xb   :  { %2368 = sst [smem:[#allocation45_spill]] %s2337_s11 }
   0xc   :  { %2369 = sst [smem:[#allocation46_spill]] %s2338_s12 }
   0xd   :  { %2370 = sst [smem:[#allocation47_spill]] %s2339_s13 }
   0xe   :  { %1283 = shalt.err (!%p1280_p2)  }
   0xf   :  { %s1680_s15 = smov [#allocation3]  }
  0x10   :  { %20 = dma.hbm_to_smem %s2326_s0, 16, %s1680_s15, [#allocation2] }
  0x11   :  { %1622 = dma.done.wait [#allocation2], 16 }
  0x12   :  { %1623 = vsyncadd [#allocation2], 4294967280 }
  0x13   :  { %22 = sfence }
  0x14   :  { %23 = vsyncpa [#allocation5], 0 }
  0x15   :  { %25 = vsyncpa [#allocation5 + $0x1], 0 }
  0x16   :  { %26 = vsyncpa [#allocation8], 0 }
  0x17   :  { %28 = vsyncpa [#allocation8 + $0x1], 0 }
  0x18   :  { %29 = vsyncpa [#allocation11], 0 }
  0x19   :  { %30 = vsyncpa [#allocation14], 0 }
  0x1a   :  { %32 = vsyncpa [#allocation14 + $0x1], 0 }
  0x1b   :  { %33 = vsyncpa [#allocation6], 0 }
  0x1c   :  { %35 = vsyncpa [#allocation6 + $0x1], 0 }
  0x1d   :  { %36 = vsyncpa [#allocation17], 0 }
  0x1e   :  { %38 = vsyncpa [#allocation17 + $0x1], 0 }
  0x1f   :  { %39 = vsyncpa [#allocation20], 0 }
  0x20   :  { %41 = vsyncpa [#allocation20 + $0x1], 0  ;;  %s1777_s18 = smov 0   ;;  %s1779_s19 = smov 0  }
  0x21   :  { %s1781_s0 = smov 0   ;;  %s1783_s20 = smov 0  }
  0x22   :  { %s1785_s21 = smov 0   ;;  %s1787_s22 = smov 0  }
  0x23 LB: > { %2371 = sst [smem:[#allocation31_spill]] %s1658_s18  ;;  %s1808_s23 = sadd.s32 4294967295, %s1678_s22   ;;  %s1678_s22 = sphi %s1787_s22, %s47_s22   ;;  %s1674_s21 = sphi %s1785_s21, %s2427_s21   ;;  %s1670_s20 = sphi %s1783_s20, %s2426_s20   ;;  %s1666_s0 = sphi %s1781_s0, %s2425_s0   ;;  %s1662_s19 = sphi %s1779_s19, %s2424_s19   ;;  %s1658_s18 = sphi %s1777_s18, %s2423_s18  }
  0x24   : > { %s2340_s24 = sadd.s32 4294967294, %s1678_s22   ;;  %p75_p3 = scmp.ne.s32.totalorder %s1666_s0, %s1662_s19 }
  0x25   : > { %p76_p4 = scmp.eq.s32.totalorder %s1678_s22, 0  ;;  %p81_p5 = scmp.ne.s32.totalorder %s1662_s19, %s1658_s18 }
  0x26   : > { %p2347_p6 = scmp.eq.s32.totalorder %s1808_s23, 0  ;;  %p273_p7 = scmp.eq.s32.totalorder %s1808_s23, 1 }
  0x27   : > { %p1819_p8 = por %p76_p4, %p75_p3  ;;  %p279_p9 = scmp.eq.s32.totalorder %s2340_s24, 1 }
  0x28   : > { %p1827_p10 = por %p2347_p6, %p81_p5  ;;  %p1831_p11 = por %p273_p7, %p75_p3 }
  0x29   : > { %s2372_s26 = scalar_select %p1819_p8, 1, 0 }
  0x2a   : > { %s2373_s27 = scalar_select %p1827_p10, 1, 0 }
  0x2b   : > { %s2374_s28 = scalar_select %p1831_p11, 1, 0 }
  0x2c   : > { %p1835_p12 = por %p279_p9, %p81_p5  ;;  %p1087_p13 = scmp.ge.s32.totalorder %s1678_s22, 1 }
  0x2d   : > { %2375 = sst [smem:[#allocation32_spill]] %s2374_s28  ;;  %p390_p0 = scmp.lt.s32.totalorder %s1678_s22, 3 }
  0x2e   : > { %s2376_s29 = scalar_select %p1835_p12, 1, 0 }
  0x2f   : > { %p1842_p2 = pnand %p1087_p13, %p390_p0  ;;  %s1681_s14 = smov [#allocation9]  }
  0x30   : > { %2377 = sst [smem:[#allocation33_spill]] %s2376_s29  ;;  %s406_s15 = sshll.u32 %s1681_s14, 4  ;;  %s407_s15 = int_to_ptr.vmem [resolvable:$true] %s406_s15 }
  0x31   : > { %s2378_s30 = scalar_select %p1842_p2, 1, 0 }
  0x32   : > { %p1159_p3 = pneg %p1842_p2  ;;  %s1682_s16 = smov [#allocation10]  }
  0x33   : > { %s417_s17 = sshll.u32 %s1682_s16, 4  ;;  %s1683_s25 = smov [#allocation12]   ;;  %s1848_s17 = int_to_ptr.vmem [resolvable:$true] %s417_s17 }
  0x34   : > { %p1852_p4 = pnand %p1159_p3, %p2347_p6  ;;  %s428_s29 = sshll.u32 %s1683_s25, 4  ;;  %s1856_s29 = int_to_ptr.vmem [resolvable:$true] %s428_s29 }
  0x35   : > { %s2380_s4 = sld [smem:[#allocation38_spill]] }
  0x36   : > { %p1866_p7 = pneg %p1852_p4 }
  0x3b   : > { %s1284_s14 = scalar_lea.hbm %s2380_s4, 128 }
  0x3c   : > { %p1285_p5 = scmp.ne.s32.totalorder %s2380_s4, %s1284_s14  ;;  %p1291_p0 = scmp.lt.u32.totalorder %s1284_s14, %s2380_s4 }
  0x3e   : > { %p1287_p9 = pnand %p1866_p7, %p1285_p5 }
  0x40   : > { %p1288_p13 = pneg %p1287_p9 }
  0x42   : > { %p1293_p3 = pnand %p1291_p0, %p1288_p13 }
  0x44   : > { %1296 = shalt.err (!%p1293_p3)
}
  0x45   : > { %s1297_s13 = scalar_lea.vmem %s407_s15, 128  ;;  %p1305_p11 = scmp.lt.s32.totalorder %s407_s15, %s407_s15 }
  0x46   : > { %p1298_p1 = scmp.ne.s32.totalorder %s407_s15, %s1297_s13  ;;  %p1306_p10 = scmp.lt.s32.totalorder %s1297_s13, %s1297_s13 }
  0x48   : > { %p1300_p6 = pnand %p1298_p1, %p1866_p7  ;;  %p1307_p2 = por %p1306_p10, %p1305_p11 }
  0x4a   : > { %p1301_p12 = pneg %p1300_p6 }
  0x4c   : > { %p1308_p8 = pnand %p1307_p2, %p1301_p12 }
  0x4e   : > { %1311 = shalt.err (!%p1308_p8)
}
  0x4f   : > { %1162 = dma.hbm_to_vmem [thread:$0]  (!%p1852_p4), %s2380_s4, 128, %s407_s15, [#allocation8]  }
  0x50   : > { %s2382_s5 = sld [smem:[#allocation39_spill]] }
  0x56   : > { %s1312_s14 = scalar_lea.hbm %s2382_s5, 128 }
  0x57   : > { %p1313_p6 = scmp.ne.s32.totalorder %s2382_s5, %s1312_s14  ;;  %p1319_p8 = scmp.lt.u32.totalorder %s1312_s14, %s2382_s5 }
  0x59   : > { %p1315_p1 = pnand %p1313_p6, %p1866_p7 }
  0x5b   : > { %p1316_p10 = pneg %p1315_p1 }
  0x5d   : > { %p1321_p11 = pnand %p1319_p8, %p1316_p10 }
  0x5f   : > { %1324 = shalt.err (!%p1321_p11)
}
  0x60   : > { %s1325_s15 = scalar_lea.vmem %s1848_s17, 128  ;;  %p1333_p9 = scmp.lt.s32.totalorder %s1848_s17, %s1848_s17 }
  0x61   : > { %p1326_p12 = scmp.ne.s32.totalorder %s1848_s17, %s1325_s15  ;;  %p1334_p13 = scmp.lt.s32.totalorder %s1325_s15, %s1325_s15 }
  0x63   : > { %p1328_p2 = pnand %p1326_p12, %p1866_p7  ;;  %p1335_p0 = por %p1334_p13, %p1333_p9 }
  0x65   : > { %p1329_p5 = pneg %p1328_p2 }
  0x67   : > { %p1336_p3 = pnand %p1335_p0, %p1329_p5 }
  0x69   : > { %1339 = shalt.err (!%p1336_p3)
}
  0x6a   : > { %1165 = dma.hbm_to_vmem [thread:$0]  (!%p1852_p4), %s2382_s5, 128, %s1848_s17, [#allocation11]  }
  0x6b   : > { %s2383_s6 = sld [smem:[#allocation40_spill]] }
  0x71   : > { %s1340_s12 = scalar_lea.hbm %s2383_s6, 128 }
  0x72   : > { %p1341_p6 = scmp.ne.s32.totalorder %s2383_s6, %s1340_s12  ;;  %p1347_p8 = scmp.lt.u32.totalorder %s1340_s12, %s2383_s6 }
  0x74   : > { %p1343_p1 = pnand %p1341_p6, %p1866_p7 }
  0x76   : > { %p1344_p10 = pneg %p1343_p1 }
  0x78   : > { %p1349_p11 = pnand %p1347_p8, %p1344_p10 }
  0x7a   : > { %1352 = shalt.err (!%p1349_p11)
}
  0x7b   : > { %s1353_s17 = scalar_lea.vmem %s1856_s29, 128  ;;  %p1361_p9 = scmp.lt.s32.totalorder %s1856_s29, %s1856_s29 }
  0x7c   : > { %p1354_p12 = scmp.ne.s32.totalorder %s1856_s29, %s1353_s17  ;;  %p1362_p13 = scmp.lt.s32.totalorder %s1353_s17, %s1353_s17 }
  0x7e   : > { %p1356_p2 = pnand %p1354_p12, %p1866_p7  ;;  %p1363_p0 = por %p1362_p13, %p1361_p9 }
  0x80   : > { %p1357_p5 = pneg %p1356_p2 }
  0x82   : > { %p1364_p3 = pnand %p1363_p0, %p1357_p5 }
  0x84   : > { %1367 = shalt.err (!%p1364_p3)
}
  0x85   : > { %1168 = dma.hbm_to_vmem [thread:$0]  (!%p1852_p4), %s2383_s6, 128, %s1856_s29, [#allocation11]  }
  0x86   : > { %s59_s16 = sadd.s32 1, %s1674_s21  ;;  %p1198_p7 = scmp.lt.s32.totalorder %s1678_s22, 2 }
  0x87   : > { %p61_p6 = scmp.ge.s32.totalorder %s59_s16, 2  ;;  %s1931_s28 = sand.u32 1, %s1666_s0  }
  0x88   : > { %s2354_s24 = sshll.u32 %s1931_s28, 4  ;;  %s2355_s9 = sshll.u32 %s1674_s21, 8 }
  0x89   : > { %s2429_s16 = smov (%p61_p6, %s59_s16), 0  ;;  %s2385_s1 = sld [smem:[#allocation35_spill]] }
  0x8a   : > { %2384 = sst [smem:[#allocation34_spill]] %s2429_s16  ;;  %s65_s11 = ssub.s32 %s1674_s21, %s2429_s16 }
  0x8b   : > { %p66_p4 = scmp.eq.s32.totalorder %s65_s11, 0  ;;  %s443_s29 = scalar_lea.vmem [#allocation4], %s2354_s24 }
  0x8c   : > { %s451_s25 = sshll.u32 %s443_s29, 4  ;;  %p2386_p1 = scmp.ne.s32.totalorder %s2372_s26, 0  ;;  %s1948_s25 = int_to_ptr.vmem [resolvable:$true] %s451_s25 }
  0x8d   : > { %s2388_s17 = sadd.s32 1, %s1666_s0  ;;  %s440_s10 = scalar_lea.sflag [#allocation5], %s1931_s28 }
  0x8e   : > { %p1952_p10 = pnand %p1198_p7, %p2386_p1 }
  0x8f   : > { %s1944_s14 = scalar_lea.hbm %s2385_s1, %s2355_s9  ;;  %s1373_s29 = scalar_lea.hbm %s2385_s1, 512 }
  0x90   : > { %s2387_s13 = scalar_select %p1952_p10, 1, 0 }
  0x91   : > { %s1959_s15 = scalar_select %p66_p4, %s1666_s0, %s2388_s17  }
  0x92   : > { %s1368_s12 = scalar_lea.hbm %s1944_s14, 256  ;;  %p1966_p11 = pneg %p1952_p10 }
  0x93   : > { %p1369_p8 = scmp.ne.s32.totalorder %s1944_s14, %s1368_s12  ;;  %p1374_p5 = scmp.lt.u32.totalorder %s1944_s14, %s2385_s1 }
  0x94   : > { %p1375_p9 = scmp.lt.u32.totalorder %s1373_s29, %s1368_s12  ;;  %p1377_p0 = scmp.lt.u32.totalorder %s1368_s12, %s1944_s14 }
  0x95   : > { %p1371_p12 = pnand %p1966_p11, %p1369_p8 }
  0x96   : > { %p1376_p13 = por %p1375_p9, %p1374_p5 }
  0x97   : > { %p1372_p2 = pneg %p1371_p12 }
  0x98   : > { %p1378_p3 = por %p1377_p0, %p1376_p13 }
  0x9a   : > { %p1379_p7 = pnand %p1378_p3, %p1372_p2 }
  0x9c   : > { %1382 = shalt.err (!%p1379_p7)
}
  0x9d   : > { %s1383_s17 = scalar_lea.vmem %s1948_s25, 256  ;;  %s1684_s26 = smov [#allocation4]  }
  0x9e   : > { %p1384_p6 = scmp.ne.s32.totalorder %s1948_s25, %s1383_s17  ;;  %s1388_s18 = sshll.u32 %s1684_s26, 4  ;;  %s1389_s18 = int_to_ptr.vmem [resolvable:$false] %s1388_s18 }
  0x9f   : > { %s1390_s24 = scalar_lea.vmem %s1389_s18, 512  ;;  %p1391_p8 = scmp.lt.s32.totalorder %s1948_s25, %s1389_s18 }
  0xa0   : > { %p1386_p4 = pnand %p1384_p6, %p1966_p11  ;;  %p1392_p12 = scmp.lt.s32.totalorder %s1390_s24, %s1383_s17 }
  0xa2   : > { %p1387_p1 = pneg %p1386_p4  ;;  %p1393_p5 = por %p1392_p12, %p1391_p8 }
  0xa4   : > { %p1394_p9 = pnand %p1393_p5, %p1387_p1 }
  0xa6   : > { %1397 = shalt.err (!%p1394_p9)
}
  0xa7   : > { %s1685_s9 = smov 128   ;;  %s1686_s12 = smov 8  }
  0xa8   : > { %1172 = dma.hbm_to_vmem [thread:$0]  (!%p1952_p10), %s1944_s14, 256, %s1948_s25, %s440_s10, %s1685_s9, %s1685_s9, %s1686_s12  }
  0xa9   : > { %s2390_s29 = sshll.u32 %s1674_s21, 8  ;;  %s2391_s2 = sld [smem:[#allocation36_spill]] }
  0xaa   : > { %s2392_s24 = sshll.u32 %s1931_s28, 4  ;;  %s461_s5 = sand.u32 1, %s1678_s22  }
  0xab   : > { %s465_s1 = scalar_lea.vmem [#allocation7], %s2392_s24  ;;  %s2006_s6 = scalar_lea.sflag [#allocation8], %s461_s5 }
  0xac   : > { %s473_s4 = sshll.u32 %s465_s1, 4  ;;  %s2003_s4 = int_to_ptr.vmem [resolvable:$true] %s473_s4 }
  0xaf   : > { %s1999_s18 = scalar_lea.hbm %s2391_s2, %s2390_s29  ;;  %s1403_s10 = scalar_lea.hbm %s2391_s2, 512 }
  0xb0   : > { %s1398_s16 = scalar_lea.hbm %s1999_s18, 256  ;;  %p1404_p3 = scmp.lt.u32.totalorder %s1999_s18, %s2391_s2 }
  0xb1   : > { %p1399_p2 = scmp.ne.s32.totalorder %s1999_s18, %s1398_s16  ;;  %p1405_p7 = scmp.lt.u32.totalorder %s1403_s10, %s1398_s16 }
  0xb2   : > { %p1407_p4 = scmp.lt.u32.totalorder %s1398_s16, %s1999_s18 }
  0xb3   : > { %p1401_p13 = pnand %p1399_p2, %p1966_p11  ;;  %p1406_p6 = por %p1405_p7, %p1404_p3 }
  0xb5   : > { %p1402_p0 = pneg %p1401_p13  ;;  %p1408_p1 = por %p1407_p4, %p1406_p6 }
  0xb7   : > { %p1409_p8 = pnand %p1408_p1, %p1402_p0 }
  0xb9   : > { %1412 = shalt.err (!%p1409_p8)
}
  0xba   : > { %s1413_s1 = scalar_lea.vmem %s2003_s4, 256  ;;  %s1687_s5 = smov [#allocation7]  }
  0xbb   : > { %p1414_p12 = scmp.ne.s32.totalorder %s2003_s4, %s1413_s1  ;;  %s1418_s26 = sshll.u32 %s1687_s5, 4  ;;  %s1419_s26 = int_to_ptr.vmem [resolvable:$false] %s1418_s26 }
  0xbc   : > { %s1420_s24 = scalar_lea.vmem %s1419_s26, 512  ;;  %p1421_p2 = scmp.lt.s32.totalorder %s2003_s4, %s1419_s26 }
  0xbd   : > { %p1416_p5 = pnand %p1414_p12, %p1966_p11  ;;  %p1422_p13 = scmp.lt.s32.totalorder %s1420_s24, %s1413_s1 }
  0xbf   : > { %p1417_p9 = pneg %p1416_p5  ;;  %p1423_p3 = por %p1422_p13, %p1421_p2 }
  0xc1   : > { %p1424_p7 = pnand %p1423_p3, %p1417_p9 }
  0xc3   : > { %1427 = shalt.err (!%p1424_p7)
}
  0xc4   : > { %1175 = dma.hbm_to_vmem [thread:$0]  (!%p1952_p10), %s1999_s18, 256, %s2003_s4, %s2006_s6, %s1685_s9, %s1685_s9, %s1686_s12  }
  0xc5   : > { %s1098_s16 = sshll.u32 %s1931_s28, 3  ;;  %s1099_s14 = sshll.u32 %s1674_s21, 7 }
  0xc6   : > { %s2393_s8 = sld [smem:[#allocation42_spill]]  ;;  %s496_s17 = scalar_lea.vmem [#allocation13], %s1098_s16 }
  0xc7   : > { %s504_s1 = sshll.u32 %s496_s17, 4  ;;  %s493_s5 = scalar_lea.sflag [#allocation14], %s1931_s28  ;;  %s505_s1 = int_to_ptr.vmem [resolvable:$true] %s504_s1 }
  0xcc   : > { %s2038_s29 = scalar_lea.hbm %s2393_s8, %s1099_s14  ;;  %s1433_s9 = scalar_lea.hbm %s2393_s8, 256 }
  0xcd   : > { %s1428_s26 = scalar_lea.hbm %s2038_s29, 128  ;;  %p1434_p1 = scmp.lt.u32.totalorder %s2038_s29, %s2393_s8 }
  0xce   : > { %p1429_p0 = scmp.ne.s32.totalorder %s2038_s29, %s1428_s26  ;;  %p1435_p8 = scmp.lt.u32.totalorder %s1433_s9, %s1428_s26 }
  0xcf   : > { %p1437_p5 = scmp.lt.u32.totalorder %s1428_s26, %s2038_s29 }
  0xd0   : > { %p1431_p6 = pnand %p1429_p0, %p1966_p11  ;;  %p1436_p12 = por %p1435_p8, %p1434_p1 }
  0xd2   : > { %p1432_p4 = pneg %p1431_p6  ;;  %p1438_p9 = por %p1437_p5, %p1436_p12 }
  0xd4   : > { %p1439_p2 = pnand %p1438_p9, %p1432_p4 }
  0xd6   : > { %1442 = shalt.err (!%p1439_p2)
}
  0xd7   : > { %s1443_s28 = scalar_lea.vmem %s505_s1, 128  ;;  %s1688_s24 = smov [#allocation13]  }
  0xd8   : > { %p1444_p13 = scmp.ne.s32.totalorder %s505_s1, %s1443_s28  ;;  %s1448_s16 = sshll.u32 %s1688_s24, 4  ;;  %s1449_s16 = int_to_ptr.vmem [resolvable:$false] %s1448_s16 }
  0xd9   : > { %s1450_s14 = scalar_lea.vmem %s1449_s16, 256  ;;  %p1451_p0 = scmp.lt.s32.totalorder %s505_s1, %s1449_s16 }
  0xda   : > { %p1446_p3 = pnand %p1444_p13, %p1966_p11  ;;  %p1452_p6 = scmp.lt.s32.totalorder %s1450_s14, %s1443_s28 }
  0xdc   : > { %p1447_p7 = pneg %p1446_p3  ;;  %p1453_p10 = por %p1452_p6, %p1451_p0 }
  0xde   : > { %p1454_p1 = pnand %p1453_p10, %p1447_p7 }
  0xe0   : > { %1457 = shalt.err (!%p1454_p1)
}
  0xe1   : > { %p2394_p8 = scmp.ne.s32.totalorder %s2387_s13, 0  ;;  %p2395_p4 = scmp.ne.s32.totalorder %s2378_s30, 0 }
  0xe2   : > { %s2061_s11 = sand.u32 (!%p2395_p4), 1, %s1662_s19   ;;  %p2396_p11 = scmp.ne.s32.totalorder (!%p2395_p4), %s2373_s27, 0 }
  0xe3   : > { %1178 = dma.hbm_to_vmem [thread:$0]  (!%p2394_p8), %s2038_s29, 128, %s505_s1, %s493_s5  }
  0xe4   : > { %513 = sbr.rel (%p2395_p4) target bundleno = 427 (0x1ab), region = 52  ;;  %s1101_s25 = sshll.u32 (!%p2395_p4), %s2061_s11, 4 }
  0xe5   : > { %s516_s10 = scalar_lea.sflag (!%p2395_p4), [#allocation5], %s2061_s11  ;;  %s2065_s17 = scalar_lea.vmem (!%p2395_p4), [#allocation4], %s1101_s25 }
  0xeb   : > { %1625 = dma.done.wait (%p2396_p11), %s516_s10, 256  }
  0xec   : > { %1627 = vsyncadd (%p2396_p11), %s516_s10, 4294967040  ;;  %s2072_s13 = sand.u32 1, %s1808_s23   ;;  %s2075_s29 = scalar_lea.vmem [#allocation7], %s1101_s25 }
  0xed   : > { %s525_s30 = scalar_lea.sflag [#allocation8], %s2072_s13 }
  0xee   : > { %1629 = dma.done.wait (%p2396_p11), %s525_s30, 256  }
  0xef   : > { %1631 = vsyncadd (%p2396_p11), %s525_s30, 4294967040  ;;  %p2397_p10 = scmp.eq.s32.totalorder %s1808_s23, 0 }
  0xf1   : > { %1633 = dma.done.wait (%p2397_p10), [#allocation8], 128   ;;  %p2398_p12 = pmov %p2397_p10 }
  0xf2   : > { %p2399_p5 = pmov %p2397_p10 }
  0xf3   : > { %1635 = vsyncadd (%p2398_p12), [#allocation8], 4294967168 }
  0xf4   : > { %1637 = dma.done.wait (%p2399_p5), [#allocation11], 256   ;;  %p2400_p9 = pmov %p2399_p5 }
  0xf5   : > { %s2090_s1 = sshll.u32 %s2061_s11, 3  ;;  %s546_s5 = scalar_lea.sflag [#allocation14], %s2061_s11 }
  0xf6   : > { %1639 = vsyncadd (%p2400_p9), [#allocation11], 4294967040 }
  0xf7   : > { %1641 = dma.done.wait (%p2396_p11), %s546_s5, 128  }
  0xf8   : > { %1643 = vsyncadd (%p2396_p11), %s546_s5, 4294967168  ;;  %p630_p2 = scmp.lt.s32.totalorder %s1670_s20, 1  ;;  %s2100_s23 = scalar_lea.vmem [#allocation15], %s2090_s1  ;;  %v1689_v0 = vmov 0.0  }
  0xf9   : > { %640 = vst [vmem:[%s2100_s23] sm:$0xff] %v1689_v0  ;;  %s2105_s6 = scalar_lea.vmem [#allocation21], %s2090_s1  ;;  %s2109_s27 = scalar_lea.vmem [#allocation16], %s2090_s1 }
  0xfa   : > { %s631_s4 = scalar_select %p630_p2, %s1670_s20, 1  ;;  %641 = vst [vmem:[%s2105_s6] sm:$0xff] %v1689_v0  ;;  %642 = vst [vmem:[%s2109_s27] sm:$0xff] %v1689_v0 }
  0xfb   : > { %s2113_s12 = scalar_lea.vmem [#allocation18], %s2090_s1  ;;  %s2117_s18 = scalar_lea.vmem [#allocation19], %s2090_s1 }
  0xfc   : > { %s1112_s9 = sshll.u32 %s631_s4, 3  ;;  %643 = vst [vmem:[%s2113_s12] sm:$0xff] %v1689_v0  ;;  %644 = vst [vmem:[%s2117_s18] sm:$0xff] %v1689_v0  ;;  %p645_p13 = scmp.eq.s32.totalorder %s1670_s20, 0 }
  0xfd   : > { %s2401_s7 = sld [smem:[#allocation41_spill]]  ;;  %s2402_s3 = sld [smem:[#allocation37_spill]] (%p645_p13)  ;;  %v654_v2 = vld [vmem:[#allocation9] sm:$0xff] (%p645_p13)  ;;  %v659_v3 = vld [vmem:[#allocation10] sm:$0xff] (%p645_p13)  ;;  %v663_v4 = vld [vmem:[#allocation12] sm:$0xff] (%p645_p13) }
  0xfe   : > { %649 = sbr.rel (!%p645_p13) target bundleno = 277 (0x115), region = 84  ;;  %664 = vst [vmem:[%s2117_s18] sm:$0xff] (%p645_p13), %v663_v4 }
 0x103   : > { %s2124_s16 = scalar_lea.vmem %s2401_s7, %s1112_s9  ;;  %v650_v1 = vld [vmem:[%s2402_s3] sm:$0xff] (%p645_p13) }
 0x104   : > { %1258 = vlog2.f32 (%p645_p13), %v650_v1 }
 0x105   : > { %1260 = vlog2.f32 %v654_v2 }
 0x106   : > { %1262 = vlog2.f32 %v659_v3 }
 0x10e   : > { %v1259_v5 = vpop.eup %1258 }
 0x10f   : > { %v1261_v6 = vpop.eup %1260  ;;  %v652_v7 = vmul.f32 0.6931472, %v1259_v5 }
 0x110   : > { %v1263_v8 = vpop.eup %1262  ;;  %v656_v9 = vmul.f32 0.6931472, %v1261_v6 }
 0x111   : > { %v661_v10 = vmul.f32 0.6931472, %v1263_v8 }
 0x112   : > { %v657_v11 = vadd.f32 %v656_v9, %v652_v7 }
 0x113   : > { %662 = vst [vmem:[%s2113_s12] sm:$0xff] %v661_v10 }
 0x114   : > { %658 = vst [vmem:[%s2109_s27] sm:$0xff] %v657_v11 }
 0x115 PF: > { %s2403_s10 = sld [smem:[#allocation32_spill]]  ;;  %s2136_s5 = sshll.u32 %s1670_s20, 7  ;;  %v667_v12 = vld [vmem:[%s2075_s29] sm:$0xff]  ;;  %v668_v13 = vld [vmem:[%s2075_s29 + $0x8] sm:$0xff] }
 0x116   : > { %s2133_s30 = sld [smem:[#allocation3 + %s1670_s20]]  ;;  %s757_s4 = sshll.u32 %s2109_s27, 4  ;;  %v669_v14 = vadd.f32 1e-07, %v667_v12  ;;  %v679_v15 = vsub.f32 1.0, %v667_v12  ;;  %s2146_s4 = int_to_ptr.vmem [resolvable:$true] %s757_s4 }
 0x117   : > { %s2404_s24 = sld [smem:[#allocation44_spill]]  ;;  %s1458_s26 = scalar_lea.vmem %s2146_s4, 128 }
 0x118   : > { %p1459_p3 = scmp.ne.s32.totalorder %s2146_s4, %s1458_s26  ;;  %s1690_s20 = smov [#allocation16]  }
 0x119   : > { %s1462_s27 = sshll.u32 %s1690_s20, 4  ;;  %s1463_s27 = int_to_ptr.vmem [resolvable:$false] %s1462_s27 }
 0x11a   : > { %s1464_s9 = scalar_lea.vmem %s1463_s27, 256  ;;  %p1465_p1 = scmp.lt.s32.totalorder %s2146_s4, %s1463_s27 }
 0x11b   : > { %p2405_p7 = scmp.ne.s32.totalorder %s2403_s10, 0  ;;  %p1466_p8 = scmp.lt.s32.totalorder %s1464_s9, %s1458_s26 }
 0x11d   : > { %s2144_s14 = scalar_lea.hbm %s2404_s24, %s2136_s5  ;;  %p1460_p0 = pnand %p1459_p3, %p2405_p7 }
 0x11e   : > { %p1467_p4 = por %p1466_p8, %p1465_p1 }
 0x11f   : > { %p1461_p6 = pneg %p1460_p0 }
 0x121   : > { %p1468_p11 = pnand %p1467_p4, %p1461_p6 }
 0x123   : > { %1471 = shalt.err (!%p1468_p11)
}
 0x124   : > { %s1472_s29 = scalar_lea.hbm %s2144_s14, 128  ;;  %s1476_s20 = scalar_lea.hbm %s2404_s24, 256 }
 0x125   : > { %p1473_p10 = scmp.ne.s32.totalorder %s2144_s14, %s1472_s29  ;;  %p1477_p9 = scmp.lt.u32.totalorder %s2144_s14, %s2404_s24 }
 0x126   : > { %p1478_p2 = scmp.lt.u32.totalorder %s1476_s20, %s1472_s29  ;;  %p1480_p3 = scmp.lt.u32.totalorder %s1472_s29, %s2144_s14 }
 0x127   : > { %p1474_p12 = pnand %p1473_p10, %p2405_p7 }
 0x128   : > { %p1479_p13 = por %p1478_p2, %p1477_p9 }
 0x129   : > { %p1475_p5 = pneg %p1474_p12 }
 0x12a   : > { %p1481_p0 = por %p1480_p3, %p1479_p13 }
 0x12c   : > { %p1482_p6 = pnand %p1481_p0, %p1475_p5 }
 0x12e   : > { %1485 = shalt.err (!%p1482_p6)
}
 0x12f   : > { %s2406_s26 = scalar_lea.sflag [#allocation17], %s2072_s13  ;;  %v670_v16 = vadd.f32 1e-07, %v668_v13  ;;  %v680_v17 = vsub.f32 1.0, %v668_v13  ;;  %s2407_s9 = sld [smem:[#allocation46_spill]]  ;;  %1264 = vlog2.f32 %v669_v14 }
 0x130   : > { %1150 = dma.vmem_to_hbm [thread:$0]  (%p2405_p7), %s2146_s4, 128, %s2144_s14, %s2406_s26   ;;  %v681_v18 = vadd.f32 1e-07, %v679_v15 }
 0x131   : > { %s783_s28 = sshll.u32 %s2117_s18, 4  ;;  %1266 = vlog2.f32 %v670_v16  ;;  %v682_v19 = vadd.f32 1e-07, %v680_v17  ;;  %s1691_s27 = smov [#allocation19]   ;;  %s2181_s28 = int_to_ptr.vmem [resolvable:$true] %s783_s28 }
 0x132   : > { %1268 = vlog2.f32 %v681_v18  ;;  %s1486_s14 = scalar_lea.vmem %s2181_s28, 128  ;;  %s1490_s26 = sshll.u32 %s1691_s27, 4  ;;  %s1491_s26 = int_to_ptr.vmem [resolvable:$false] %s1490_s26 }
 0x133   : > { %p1487_p1 = scmp.ne.s32.totalorder %s2181_s28, %s1486_s14  ;;  %s1492_s2 = scalar_lea.vmem %s1491_s26, 256 }
 0x134   : > { %p1493_p11 = scmp.lt.s32.totalorder %s2181_s28, %s1491_s26  ;;  %p1494_p10 = scmp.lt.s32.totalorder %s1492_s2, %s1486_s14 }
 0x135   : > { %s2177_s29 = scalar_lea.hbm %s2407_s9, %s2136_s5  ;;  %p1488_p8 = pnand %p1487_p1, %p2405_p7 }
 0x136   : > { %p1495_p12 = por %p1494_p10, %p1493_p11 }
 0x137   : > { %p1489_p4 = pneg %p1488_p8 }
 0x139   : > { %p1496_p5 = pnand %p1495_p12, %p1489_p4 }
 0x13b   : > { %1499 = shalt.err (!%p1496_p5)
}
 0x13c   : > { %s1500_s18 = scalar_lea.hbm %s2177_s29, 128  ;;  %s1504_s27 = scalar_lea.hbm %s2407_s9, 256 }
 0x13d   : > { %p1501_p9 = scmp.ne.s32.totalorder %s2177_s29, %s1500_s18  ;;  %p1505_p3 = scmp.lt.u32.totalorder %s2177_s29, %s2407_s9 }
 0x13e   : > { %p1506_p0 = scmp.lt.u32.totalorder %s1504_s27, %s1500_s18  ;;  %p1508_p1 = scmp.lt.u32.totalorder %s1500_s18, %s2177_s29 }
 0x13f   : > { %p1502_p2 = pnand %p1501_p9, %p2405_p7 }
 0x140   : > { %p1507_p6 = por %p1506_p0, %p1505_p3 }
 0x141   : > { %p1503_p13 = pneg %p1502_p2 }
 0x142   : > { %p1509_p8 = por %p1508_p1, %p1507_p6 }
 0x144   : > { %p1510_p4 = pnand %p1509_p8, %p1503_p13 }
 0x146   : > { %1513 = shalt.err (!%p1510_p4)
}
 0x147   : > { %s2408_s14 = scalar_lea.sflag [#allocation20], %s2072_s13  ;;  %1270 = vlog2.f32 %v682_v19  ;;  %s2409_s20 = scvt.s32.f32 %s2133_s30  ;;  %v665_v21 = vld [vmem:[%s2065_s17] sm:$0xff] }
 0x148   : > { %1152 = dma.vmem_to_hbm [thread:$0]  (%p2405_p7), %s2181_s28, 128, %s2177_s29, %s2408_s14  }
 0x149   : > { %v702_v20 = vstv %s2409_s20  ;;  %s2410_s18 = sld [smem:[#allocation45_spill]]  ;;  %s770_s26 = sshll.u32 %s2113_s12, 4  ;;  %s771_s26 = int_to_ptr.vmem [resolvable:$true] %s770_s26 }
 0x14a   : > { %1272 = vrcp.f32 %v702_v20  ;;  %s1514_s3 = scalar_lea.vmem %s771_s26, 128  ;;  %s1692_s7 = smov [#allocation18]  }
 0x14b   : > { %p1515_p11 = scmp.ne.s32.totalorder %s771_s26, %s1514_s3  ;;  %s1518_s8 = sshll.u32 %s1692_s7, 4  ;;  %s1519_s8 = int_to_ptr.vmem [resolvable:$false] %s1518_s8 }
 0x14c   : > { %s1520_s29 = scalar_lea.vmem %s1519_s8, 256  ;;  %p1521_p5 = scmp.lt.s32.totalorder %s771_s26, %s1519_s8 }
 0x14d   : > { %p1516_p10 = pnand %p1515_p11, %p2405_p7  ;;  %p1522_p9 = scmp.lt.s32.totalorder %s1520_s29, %s1514_s3 }
 0x14f   : > { %s2411_s25 = smov %s2410_s18  ;;  %s2213_s27 = scalar_lea.hbm %s2410_s18, %s2136_s5 }
 0x150   : > { %p1517_p12 = pneg %p1516_p10  ;;  %p1523_p2 = por %p1522_p9, %p1521_p5 }
 0x152   : > { %p1524_p13 = pnand %p1523_p2, %p1517_p12 }
 0x154   : > { %1527 = shalt.err (!%p1524_p13)
}
 0x155   : > { %s1528_s12 = scalar_lea.hbm %s2213_s27, 128  ;;  %s1532_s7 = scalar_lea.hbm %s2411_s25, 256 }
 0x156   : > { %p1529_p3 = scmp.ne.s32.totalorder %s2213_s27, %s1528_s12  ;;  %p1533_p1 = scmp.lt.u32.totalorder %s2213_s27, %s2411_s25 }
 0x157   : > { %p1534_p8 = scmp.lt.u32.totalorder %s1532_s7, %s1528_s12  ;;  %p1536_p11 = scmp.lt.u32.totalorder %s1528_s12, %s2213_s27 }
 0x158   : > { %p1530_p0 = pnand %p1529_p3, %p2405_p7 }
 0x159   : > { %p1535_p4 = por %p1534_p8, %p1533_p1 }
 0x15a   : > { %p1531_p6 = pneg %p1530_p0 }
 0x15b   : > { %p1537_p10 = por %p1536_p11, %p1535_p4 }
 0x15d   : > { %p1538_p12 = pnand %p1537_p10, %p1531_p6 }
 0x15f   : > { %1541 = shalt.err (!%p1538_p12)
}
 0x160   : > { %s2412_s3 = scalar_lea.sflag [#allocation17], %s2072_s13  ;;  %v666_v22 = vld [vmem:[%s2065_s17 + $0x8] sm:$0xff]  ;;  %v1265_v23 = vpop.eup %1264  ;;  %v677_v26 = vsub.f32 1.0, %v665_v21  ;;  %s744_s17 = sshll.u32 %s2100_s23, 4  ;;  %s2245_s17 = int_to_ptr.vmem [resolvable:$true] %s744_s17 }
 0x161   : > { %1151 = dma.vmem_to_hbm [thread:$0]  (%p2405_p7), %s771_s26, 128, %s2213_s27, %s2412_s3   ;;  %v1267_v24 = vpop.eup %1266  ;;  %v672_v25 = vmul.f32 0.6931472, %v1265_v23  ;;  %v678_v29 = vsub.f32 1.0, %v666_v22  ;;  %v691_v40 = vld [vmem:[%s2100_s23] sm:$0xff] }
 0x162   : > { %v1269_v27 = vpop.eup %1268  ;;  %v674_v28 = vmul.f32 0.6931472, %v1267_v24  ;;  %s2413_s2 = sld [smem:[#allocation43_spill]]  ;;  %s711_s27 = scalar_lea.sflag [#allocation6], %s2061_s11 }
 0x163   : > { %v1271_v30 = vpop.eup %1270  ;;  %v675_v31 = vmul.f32 %v672_v25, %v665_v21  ;;  %v684_v32 = vmul.f32 0.6931472, %v1269_v27  ;;  %s1542_s26 = scalar_lea.vmem %s2245_s17, 128  ;;  %s1693_s29 = smov [#allocation15]  }
 0x164   : > { %v676_v33 = vmul.f32 %v674_v28, %v666_v22  ;;  %v686_v34 = vmul.f32 0.6931472, %v1271_v30  ;;  %v1273_v35 = vpop.eup %1272  ;;  %p1543_p5 = scmp.ne.s32.totalorder %s2245_s17, %s1542_s26  ;;  %s1546_s12 = sshll.u32 %s1693_s29, 4  ;;  %s1547_s12 = int_to_ptr.vmem [resolvable:$false] %s1546_s12 }
 0x165   : > { %v687_v36 = vmul.f32 %v684_v32, %v677_v26  ;;  %1129 = vpush %v1273_v35  ;;  %s1548_s30 = scalar_lea.vmem %s1547_s12, 256  ;;  %p1549_p13 = scmp.lt.s32.totalorder %s2245_s17, %s1547_s12 }
 0x166   : > { %v688_v37 = vmul.f32 %v686_v34, %v678_v29  ;;  %p1544_p9 = pnand %p1543_p5, %p2405_p7  ;;  %p1550_p3 = scmp.lt.s32.totalorder %s1548_s30, %s1542_s26 }
 0x167   : > { %v689_v38 = vadd.f32 %v687_v36, %v675_v31 }
 0x168   : > { %v690_v39 = vadd.f32 %v688_v37, %v676_v33  ;;  %s2243_s18 = scalar_lea.hbm %s2413_s2, %s2136_s5  ;;  %p1545_p2 = pneg %p1544_p9 }
 0x169   : > { %p1551_p0 = por %p1550_p3, %p1549_p13 }
 0x16a   : > { %v692_v41 = vadd.f32 %v690_v39, %v689_v38 }
 0x16b   : > { %p1552_p6 = pnand %p1551_p0, %p1545_p2 }
 0x16c   : > { %v693_v42 = vadd.f32 %v692_v41, %v691_v40 }
 0x16e   : > { %694 = vst [vmem:[%s2100_s23] sm:$0xff] %v693_v42 }
 0x16f   : > { %1555 = shalt.err (!%p1552_p6)
}
 0x170   : > { %s1556_s11 = scalar_lea.hbm %s2243_s18, 128  ;;  %s1560_s7 = scalar_lea.hbm %s2413_s2, 256 }
 0x171   : > { %p1557_p1 = scmp.ne.s32.totalorder %s2243_s18, %s1556_s11  ;;  %p1561_p11 = scmp.lt.u32.totalorder %s2243_s18, %s2413_s2 }
 0x172   : > { %p1562_p10 = scmp.lt.u32.totalorder %s1560_s7, %s1556_s11  ;;  %p1564_p5 = scmp.lt.u32.totalorder %s1556_s11, %s2243_s18 }
 0x173   : > { %p1558_p8 = pnand %p1557_p1, %p2405_p7 }
 0x174   : > { %p1563_p12 = por %p1562_p10, %p1561_p11 }
 0x175   : > { %p1559_p4 = pneg %p1558_p8 }
 0x176   : > { %p1565_p9 = por %p1564_p5, %p1563_p12 }
 0x178   : > { %p1566_p2 = pnand %p1565_p9, %p1559_p4 }
 0x17a   : > { %1569 = shalt.err (!%p1566_p2)
}
 0x17b   : > { %1149 = dma.vmem_to_hbm [thread:$0]  (%p2405_p7), %s2245_s17, 128, %s2243_s18, %s711_s27   ;;  %v695_v43 = vld [vmem:[%s2124_s16] sm:$0xff] }
 0x17c   : > { %s2414_s3 = scalar_lea.vmem [#allocation13], %s2090_s1  ;;  %v705_v47 = vld [vmem:[%s2105_s6] sm:$0xff]  ;;  %s796_s4 = sshll.u32 %s2105_s6, 4  ;;  %s797_s4 = int_to_ptr.vmem [resolvable:$true] %s796_s4 }
 0x17d   : > { %v696_v44 = vld [vmem:[%s2414_s3] sm:$0xff]  ;;  %s2415_s12 = sld [smem:[#allocation47_spill]]  ;;  %s1570_s17 = scalar_lea.vmem %s797_s4, 128 }
 0x17e   : > { %v697_v45 = vsub.f32 %v695_v43, %v696_v44  ;;  %p1571_p13 = scmp.ne.s32.totalorder %s797_s4, %s1570_s17  ;;  %s1694_s1 = smov [#allocation21]  }
 0x17f   : > { %s1574_s16 = sshll.u32 %s1694_s1, 4  ;;  %s1575_s16 = int_to_ptr.vmem [resolvable:$false] %s1574_s16 }
 0x180   : > { %v698_v46 = vand.u32 2147483647, %v697_v45  ;;  %p1572_p3 = pnand %p1571_p13, %p2405_p7  ;;  %s1576_s18 = scalar_lea.vmem %s1575_s16, 256 }
 0x181   : > { %p1577_p6 = scmp.lt.s32.totalorder %s797_s4, %s1575_s16  ;;  %p1578_p1 = scmp.lt.s32.totalorder %s1576_s18, %s1570_s17 }
 0x182   : > { %p1573_p0 = pneg %p1572_p3 }
 0x183   : > { %s2279_s30 = scalar_lea.hbm %s2415_s12, %s2136_s5  ;;  %p1579_p8 = por %p1578_p1, %p1577_p6 }
 0x185   : > { %p1580_p4 = pnand %p1579_p8, %p1573_p0 }
 0x196   : > { %s1130_s20 = spop %1129 }
 0x197   : > { %v706_v48 = vstv %s1130_s20 }
 0x198   : > { %v707_v49 = vmul.f32 %v706_v48, %v698_v46 }
 0x19a   : > { %v708_v50 = vadd.f32 %v707_v49, %v705_v47 }
 0x19c   : > { %709 = vst [vmem:[%s2105_s6] sm:$0xff] %v708_v50 }
 0x19d   : > { %1583 = shalt.err (!%p1580_p4)
}
 0x19e   : > { %s1584_s6 = scalar_lea.hbm %s2279_s30, 128  ;;  %s1588_s11 = scalar_lea.hbm %s2415_s12, 256 }
 0x19f   : > { %p1585_p11 = scmp.ne.s32.totalorder %s2279_s30, %s1584_s6  ;;  %p1589_p5 = scmp.lt.u32.totalorder %s2279_s30, %s2415_s12 }
 0x1a0   : > { %p1590_p9 = scmp.lt.u32.totalorder %s1588_s11, %s1584_s6  ;;  %p1592_p13 = scmp.lt.u32.totalorder %s1584_s6, %s2279_s30 }
 0x1a1   : > { %p1586_p10 = pnand %p1585_p11, %p2405_p7 }
 0x1a2   : > { %p1591_p2 = por %p1590_p9, %p1589_p5 }
 0x1a3   : > { %p1587_p12 = pneg %p1586_p10 }
 0x1a4   : > { %p1593_p3 = por %p1592_p13, %p1591_p2 }
 0x1a6   : > { %p1594_p0 = pnand %p1593_p3, %p1587_p12 }
 0x1a8   : > { %1597 = shalt.err (!%p1594_p0)
}
 0x1a9   : > { %s2416_s7 = scalar_lea.sflag [#allocation20], %s2072_s13 }
 0x1aa   : > { %1153 = dma.vmem_to_hbm [thread:$0]  (%p2405_p7), %s797_s4, 128, %s2279_s30, %s2416_s7  }
 0x1ab PF: > { %s2417_s14 = sld [smem:[#allocation31_spill]]  ;;  %s2418_s8 = sld [smem:[#allocation33_spill]] }
 0x1ac   : > { %p2420_p1 = scmp.ge.s32.totalorder %s1678_s22, 2 }
 0x1b1   : > { %s808_s3 = sand.u32 1, %s2417_s14   ;;  %p2419_p6 = scmp.ne.s32.totalorder %s2418_s8, 0 }
 0x1b2   : > { %s809_s20 = scalar_lea.sflag [#allocation6], %s808_s3 }
 0x1b3   : > { %p1180_p8 = pnand %p2420_p1, %p2419_p6 }
 0x1b5   : > { %1645 = dma.done.wait (!%p1180_p8), %s809_s20, 128  }
 0x1b6   : > { %1647 = vsyncadd (!%p1180_p8), %s809_s20, 4294967168  ;;  %s2421_s26 = sadd.s32 4294967294, %s1678_s22  }
 0x1b7   : > { %s817_s29 = sand.u32 1, %s2421_s26  }
 0x1b8   : > { %s818_s17 = scalar_lea.sflag [#allocation17], %s817_s29 }
 0x1b9   : > { %1649 = dma.done.wait (!%p1180_p8), %s818_s17, 256  }
 0x1ba   : > { %1651 = vsyncadd (!%p1180_p8), %s818_s17, 4294967040  ;;  %s836_s13 = scalar_lea.sflag [#allocation20], %s817_s29 }
 0x1bb   : > { %1653 = dma.done.wait (!%p1180_p8), %s836_s13, 256  }
 0x1bc   : > { %1655 = vsyncadd (!%p1180_p8), %s836_s13, 4294967040  ;;  %s47_s22 = sadd.s32 1, %s1678_s22   ;;  %s2422_s10 = sld [smem:[#allocation34_spill]] }
 0x1bd   : > { %p44_p7 = scmp.ge.s32.totalorder %s47_s22, 4   ;;  %s2423_s18 = smov %s1662_s19 }
 0x1be   : > { %s2424_s19 = smov %s1666_s0  ;;  %s2425_s0 = smov %s1959_s15 }
 0x1bf   : > { %s2426_s20 = smov %s1674_s21  ;;  %46 = sbr.rel (!%p44_p7) target bundleno = 35 (0x23), region = 210 }
 0x1c2   : > { %s2427_s21 = smov %s2422_s10 }
 0x1c6   :  { %850 = vsyncpa [#allocation5], 1 }
 0x1c7   :  { %852 = vsyncpa [#allocation5 + $0x1], 1 }
 0x1c8   :  { %853 = vsyncpa [#allocation8], 1 }
 0x1c9   :  { %855 = vsyncpa [#allocation8 + $0x1], 1 }
 0x1ca   :  { %856 = vsyncpa [#allocation11], 1 }
 0x1cb   :  { %857 = vsyncpa [#allocation14], 1 }
 0x1cc   :  { %859 = vsyncpa [#allocation14 + $0x1], 1 }
 0x1cd   :  { %860 = vsyncpa [#allocation6], 1 }
 0x1ce   :  { %862 = vsyncpa [#allocation6 + $0x1], 1 }
 0x1cf   :  { %863 = vsyncpa [#allocation17], 1 }
 0x1d0   :  { %865 = vsyncpa [#allocation17 + $0x1], 1 }
 0x1d1   :  { %866 = vsyncpa [#allocation20], 1 }
 0x1d2   :  { %868 = vsyncpa [#allocation20 + $0x1], 1 }

</bundles_post_ra>
